<compile_context>
chip_gen: v7x
topology: tpu7x:2x2x1
jax: 0.10.0
libtpu: 0.0.40
codegen_flags: <defaults>
</compile_context>

<pallas_src>
import functools
import numpy as np
import jax
import jax.numpy as jnp
from jax.experimental import pallas as pl
from jax.experimental.pallas import tpu as pltpu

_VMEM_LIMIT = 48 * 1024 * 1024  # <= 48 MiB: safe headroom even on v7x (64 MiB/TC)


def _pick_tile(dim, prefs):
    """Largest preferred tile that divides dim, else the full dim (always legal)."""
    for t in prefs:
        if t <= dim and dim % t == 0:
            return t
    return dim


# ----------------------------------------------------------------------------
# Tiled matmul (+bias, +optional ReLU)
# ----------------------------------------------------------------------------
def _mm_kernel(x_ref, w_ref, b_ref, o_ref, acc_ref, *, act, nk):
    k = pl.program_id(2)

    @pl.when(k == 0)
    def _():
        acc_ref[...] = jnp.zeros_like(acc_ref)

    acc_ref[...] += jnp.dot(x_ref[...], w_ref[...],
                            preferred_element_type=jnp.float32)

    @pl.when(k == nk - 1)
    def _():
        y = acc_ref[...] + b_ref[...]
        if act == "relu":
            y = jnp.maximum(y, 0.0)
        o_ref[...] = y.astype(o_ref.dtype)


def matmul_bias(x, w, b, act="none", out_dtype=jnp.bfloat16):
    """Y = act(X @ W + b).  bf16 MXU inputs, f32 accumulation, tiled."""
    M, K = x.shape
    K2, N = w.shape
    assert K == K2
    tm = _pick_tile(M, (256, 128))
    tn = _pick_tile(N, (512, 256, 128))
    tk = _pick_tile(K, (512, 256))
    nk = K // tk
    return pl.pallas_call(
        functools.partial(_mm_kernel, act=act, nk=nk),
        out_shape=jax.ShapeDtypeStruct((M, N), out_dtype),
        grid=(M // tm, N // tn, nk),
        in_specs=[pl.BlockSpec((tm, tk), lambda i, j, k: (i, k)),
                  pl.BlockSpec((tk, tn), lambda i, j, k: (k, j)),
                  pl.BlockSpec((1, tn), lambda i, j, k: (0, j))],
        out_specs=pl.BlockSpec((tm, tn), lambda i, j, k: (i, j)),
        scratch_shapes=[pltpu.VMEM((tm, tn), jnp.float32)],
        compiler_params=pltpu.CompilerParams(
            dimension_semantics=("parallel", "parallel", "arbitrary"),
            vmem_limit_bytes=_VMEM_LIMIT),
    )(x.astype(jnp.bfloat16), w.astype(jnp.bfloat16),
      b.reshape(1, N).astype(jnp.float32))


# ----------------------------------------------------------------------------
# Fused matmul + bias + residual + LayerNorm (post-LN transformer epilogue)
# ----------------------------------------------------------------------------
def _mm_res_ln_kernel(x_ref, w_ref, b_ref, r_ref, g_ref, bb_ref, o_ref,
                      acc_ref, *, nk, eps):
    k = pl.program_id(1)

    @pl.when(k == 0)
    def _():
        acc_ref[...] = jnp.zeros_like(acc_ref)

    acc_ref[...] += jnp.dot(x_ref[...], w_ref[...],
                            preferred_element_type=jnp.float32)

    @pl.when(k == nk - 1)
    def _():
        y = acc_ref[...] + b_ref[...] + r_ref[...].astype(jnp.float32)
        mu = jnp.mean(y, axis=-1, keepdims=True)
        var = jnp.mean(jnp.square(y - mu), axis=-1, keepdims=True)
        o_ref[...] = ((y - mu) * jax.lax.rsqrt(var + eps) * g_ref[...]
                      + bb_ref[...]).astype(o_ref.dtype)


def matmul_residual_layernorm(x, w, b, res, gamma, beta,
                              out_dtype=jnp.bfloat16, eps=1e-5):
    """LN(res + X @ W + b); LayerNorm stats are per-row so N stays untiled."""
    M, K = x.shape
    K2, N = w.shape
    assert K == K2 and res.shape == (M, N)
    tm = _pick_tile(M, (256, 128))
    tk = _pick_tile(K, (512, 256))
    nk = K // tk
    return pl.pallas_call(
        functools.partial(_mm_res_ln_kernel, nk=nk, eps=eps),
        out_shape=jax.ShapeDtypeStruct((M, N), out_dtype),
        grid=(M // tm, nk),
        in_specs=[pl.BlockSpec((tm, tk), lambda i, k: (i, k)),
                  pl.BlockSpec((tk, N), lambda i, k: (k, 0)),
                  pl.BlockSpec((1, N), lambda i, k: (0, 0)),
                  pl.BlockSpec((tm, N), lambda i, k: (i, 0)),
                  pl.BlockSpec((1, N), lambda i, k: (0, 0)),
                  pl.BlockSpec((1, N), lambda i, k: (0, 0))],
        out_specs=pl.BlockSpec((tm, N), lambda i, k: (i, 0)),
        scratch_shapes=[pltpu.VMEM((tm, N), jnp.float32)],
        compiler_params=pltpu.CompilerParams(
            dimension_semantics=("parallel", "arbitrary"),
            vmem_limit_bytes=_VMEM_LIMIT),
    )(x.astype(jnp.bfloat16), w.astype(jnp.bfloat16),
      b.reshape(1, N).astype(jnp.float32),
      res.astype(jnp.bfloat16),
      gamma.reshape(1, N).astype(jnp.float32),
      beta.reshape(1, N).astype(jnp.float32))


# ----------------------------------------------------------------------------
# Conv1d ('same') + folded BN + ReLU, via in-kernel tap accumulation (no im2col)
# ----------------------------------------------------------------------------
def _conv_bn_relu_kernel(xp_ref, w_ref, b_ref, o_ref, *, ktaps):
    L = o_ref.shape[1]
    Cout = o_ref.shape[2]
    acc = jnp.zeros((L, Cout), jnp.float32)
    for tap in range(ktaps):                       # static unroll, k=5
        acc = acc + jnp.dot(xp_ref[0, tap:tap + L, :], w_ref[tap],
                            preferred_element_type=jnp.float32)
    o_ref[0] = jnp.maximum(acc + b_ref[...], 0.0).astype(o_ref.dtype)


def conv1d_bn_relu(x_blc, w_kio, b, ktaps):
    """x:(B,L,Cin), w:(k,Cin,Cout) (BN already folded), b:(Cout,) -> (B,L,Cout)."""
    B, L, Cin = x_blc.shape
    Cout = w_kio.shape[2]
    pad = ktaps // 2
    xp = jnp.pad(x_blc.astype(jnp.bfloat16), ((0, 0), (pad, pad), (0, 0)))
    Lp = L + 2 * pad
    return pl.pallas_call(
        functools.partial(_conv_bn_relu_kernel, ktaps=ktaps),
        out_shape=jax.ShapeDtypeStruct((B, L, Cout), jnp.bfloat16),
        grid=(B,),
        in_specs=[pl.BlockSpec((1, Lp, Cin), lambda bb: (bb, 0, 0)),
                  pl.BlockSpec((ktaps, Cin, Cout), lambda bb: (0, 0, 0)),
                  pl.BlockSpec((1, Cout), lambda bb: (0, 0))],
        out_specs=pl.BlockSpec((1, L, Cout), lambda bb: (bb, 0, 0)),
        compiler_params=pltpu.CompilerParams(
            dimension_semantics=("parallel",),
            vmem_limit_bytes=_VMEM_LIMIT),
    )(xp, w_kio.astype(jnp.bfloat16), b.reshape(1, Cout).astype(jnp.float32))


# ----------------------------------------------------------------------------
# Fused bidirectional LSTM recurrence (fwd + bwd per grid step)
# ----------------------------------------------------------------------------
def _bilstm_kernel(gxf_ref, gxb_ref, whhf_ref, whhb_ref, of_ref, ob_ref,
                   hf, cf, hb, cb):
    t = pl.program_id(0)
    H = hf.shape[1]

    @pl.when(t == 0)
    def _():
        hf[...] = jnp.zeros_like(hf)
        cf[...] = jnp.zeros_like(cf)
        hb[...] = jnp.zeros_like(hb)
        cb[...] = jnp.zeros_like(cb)

    def direction(gx, whh_ref, h_scr, c_scr, out_ref):
        gates = gx.astype(jnp.float32) + jnp.dot(
            h_scr[...].astype(jnp.bfloat16), whh_ref[...],
            preferred_element_type=jnp.float32)               # (B, 4H)
        i = jax.nn.sigmoid(gates[:, 0:H])
        f = jax.nn.sigmoid(gates[:, H:2 * H])
        g = jnp.tanh(gates[:, 2 * H:3 * H])
        o = jax.nn.sigmoid(gates[:, 3 * H:4 * H])
        c = f * c_scr[...] + i * g
        h = o * jnp.tanh(c)
        c_scr[...] = c
        h_scr[...] = h
        out_ref[0] = h.astype(out_ref.dtype)

    direction(gxf_ref[0], whhf_ref, hf, cf, of_ref)
    direction(gxb_ref[0], whhb_ref, hb, cb, ob_ref)


def bilstm_layer(x_tbc, wih_f, whh_f, b_f, wih_b, whh_b, b_b):
    """One bidirectional LSTM layer.  x:(T,B,Din) -> (T,B,2H)."""
    T, B, Din = x_tbc.shape
    H = whh_f.shape[0]
    G = 4 * H

    # Single input-gate GEMM covering both directions: (T*B, Din) @ (Din, 8H).
    wih = jnp.concatenate([wih_f, wih_b], axis=1)
    bih = jnp.concatenate([b_f, b_b], axis=0)
    gx = matmul_bias(x_tbc.reshape(T * B, Din), wih, bih)       # (T*B, 8H) bf16
    gx = gx.reshape(T, B, 2 * G)

    h_f, h_b = pl.pallas_call(
        _bilstm_kernel,
        out_shape=(jax.ShapeDtypeStruct((T, B, H), jnp.bfloat16),
                   jax.ShapeDtypeStruct((T, B, H), jnp.bfloat16)),
        grid=(T,),
        in_specs=[pl.BlockSpec((1, B, G), lambda t: (t, 0, 0)),          # fwd gates
                  pl.BlockSpec((1, B, G), lambda t: (T - 1 - t, 0, 1)),  # bwd gates (reversed time)
                  pl.BlockSpec((H, G), lambda t: (0, 0)),
                  pl.BlockSpec((H, G), lambda t: (0, 0))],
        out_specs=(pl.BlockSpec((1, B, H), lambda t: (t, 0, 0)),
                   pl.BlockSpec((1, B, H), lambda t: (T - 1 - t, 0, 0))),
        scratch_shapes=[pltpu.VMEM((B, H), jnp.float32),
                        pltpu.VMEM((B, H), jnp.float32),
                        pltpu.VMEM((B, H), jnp.float32),
                        pltpu.VMEM((B, H), jnp.float32)],
        compiler_params=pltpu.CompilerParams(
            dimension_semantics=("arbitrary",),
            vmem_limit_bytes=_VMEM_LIMIT),
    )(gx, gx, whh_f.astype(jnp.bfloat16), whh_b.astype(jnp.bfloat16))
    return jnp.concatenate([h_f, h_b], axis=-1)                 # (T, B, 2H)


# ----------------------------------------------------------------------------
# Multi-head attention: all heads of one batch element per grid step
# ----------------------------------------------------------------------------
def _mha_kernel(q_ref, k_ref, v_ref, o_ref, *, scale):
    s = jnp.einsum('hqd,hkd->hqk', q_ref[...], k_ref[...],
                   preferred_element_type=jnp.float32) * scale
    m = jnp.max(s, axis=-1, keepdims=True)
    p = jnp.exp(s - m)
    p = p * pl.reciprocal(jnp.sum(p, axis=-1, keepdims=True), approx=True)
    ctx = jnp.einsum('hqk,hkd->hqd', p.astype(v_ref.dtype), v_ref[...],
                     preferred_element_type=jnp.float32)
    o_ref[...] = ctx.astype(o_ref.dtype)


def mha(q, k, v, nheads):
    """q/k/v: (B*H, L, dh).  grid=(B,); 64 heads batched per step."""
    BH, L, dh = q.shape
    B = BH // nheads
    scale = 1.0 / float(np.sqrt(dh))
    spec = pl.BlockSpec((nheads, L, dh), lambda b: (b, 0, 0))
    return pl.pallas_call(
        functools.partial(_mha_kernel, scale=scale),
        out_shape=jax.ShapeDtypeStruct((BH, L, dh), jnp.bfloat16),
        grid=(B,),
        in_specs=[spec, spec, spec],
        out_specs=spec,
        compiler_params=pltpu.CompilerParams(
            dimension_semantics=("parallel",),
            vmem_limit_bytes=_VMEM_LIMIT),
    )(q.astype(jnp.bfloat16), k.astype(jnp.bfloat16), v.astype(jnp.bfloat16))


# ----------------------------------------------------------------------------
# Model pieces (glue + Pallas calls)
# ----------------------------------------------------------------------------
def fold_bn(w, b, gamma, beta, mean, var, eps=1e-5):
    """Fold eval-mode BatchNorm into (k, Cin, Cout) conv weights + bias."""
    s = gamma / jnp.sqrt(var + eps)
    return w * s[None, None, :], (b - mean) * s + beta


def transformer_layer(src, p, nheads=64):
    """PyTorch TransformerEncoderLayer (post-LN, relu, eval).  src:(L,B,E)."""
    L, B, E = src.shape
    dh = E // nheads
    x = src.reshape(L * B, E)

    qkv = matmul_bias(x, p['attn_in_w'], p['attn_in_b'])            # (L*B, 3E)
    qkv = qkv.reshape(L, B, 3, nheads, dh)

    def to_heads(t):
        return t.transpose(1, 2, 0, 3).reshape(B * nheads, L, dh)

    ctx = mha(to_heads(qkv[:, :, 0]), to_heads(qkv[:, :, 1]),
              to_heads(qkv[:, :, 2]), nheads)                       # (B*H, L, dh)
    ctx = ctx.reshape(B, nheads, L, dh).transpose(2, 0, 1, 3).reshape(L * B, E)

    # out-proj + residual + LayerNorm fused
    x = matmul_residual_layernorm(ctx, p['attn_out_w'], p['attn_out_b'],
                                  x, p['norm1_g'], p['norm1_b'])
    ff = matmul_bias(x, p['ffn1_w'], p['ffn1_b'], act="relu")
    # ffn2 + residual + LayerNorm fused
    x = matmul_residual_layernorm(ff, p['ffn2_w'], p['ffn2_b'],
                                  x, p['norm2_g'], p['norm2_b'])
    return x.reshape(L, B, E)


def forward(params, features, masks, idx=None):
    """features:(B,15,L) f32 (PyTorch NCW), masks:(B,L) bool -> (n_sel, 5)."""
    B, Cin, L = features.shape
    x = jnp.transpose(features, (0, 2, 1))                          # (B, L, 15)

    # DoubleConv (BN folded, eval mode); `idx` ignored (see TODO at top).
    w1, b1 = fold_bn(params['conv1_w'], params['conv1_b'], params['bn1_gamma'],
                     params['bn1_beta'], params['bn1_mean'], params['bn1_var'])
    x = conv1d_bn_relu(x, w1, b1, 5)                                # (B, L, 256)
    w2, b2 = fold_bn(params['conv2_w'], params['conv2_b'], params['bn2_gamma'],
                     params['bn2_beta'], params['bn2_mean'], params['bn2_var'])
    x = conv1d_bn_relu(x, w2, b2, 5)                                # (B, L, 256)

    # Bidirectional 2-layer LSTM (zero initial state; dropout off in eval).
    x_tbc = jnp.transpose(x, (1, 0, 2))                             # (L, B, 256)
    for layer in range(2):
        x_tbc = bilstm_layer(
            x_tbc,
            params[f'lstm_l{layer}_fwd_wih'], params[f'lstm_l{layer}_fwd_whh'],
            params[f'lstm_l{layer}_fwd_b'],
            params[f'lstm_l{layer}_bwd_wih'], params[f'lstm_l{layer}_bwd_whh'],
            params[f'lstm_l{layer}_bwd_b'])                         # (L, B, 512)

    # 3 independent transformer encoder layers (deep-copied in PyTorch).
    src = x_tbc
    for lp in params['encoder_layers']:
        src = transformer_layer(src, lp)

    # Head on all rows (lane-padded to 128 outputs), then on-device selection.
    x_flat = jnp.transpose(src, (1, 0, 2)).reshape(-1, 512)         # (B*L, 512)
    logits = matmul_bias(x_flat, params['head_w_pad'], params['head_b_pad'],
                         out_dtype=jnp.float32)[:, :5]
    masks_flat = jnp.asarray(masks).reshape(-1)
    return logits[masks_flat]


# ----------------------------------------------------------------------------
# Deterministic parameter init (synthetic; shapes from the module __init__)
# ----------------------------------------------------------------------------
def init_params(key):
    keys = iter(jax.random.split(key, 128))

    def nrm(shape, scale=0.05):
        return scale * jax.random.normal(next(keys), shape, dtype=jnp.float32)

    p = {}
    # DoubleConv(15, 256, 5): conv weights stored tap-major (k, Cin, Cout)
    p['conv1_w'] = nrm((5, 15, 256))
    p['conv1_b'] = nrm((256,), 0.01)
    p['bn1_gamma'] = 1.0 + nrm((256,), 0.01)
    p['bn1_beta'] = nrm((256,), 0.01)
    p['bn1_mean'] = nrm((256,), 0.01)
    p['bn1_var'] = 1.0 + jnp.abs(nrm((256,), 0.01))
    p['conv2_w'] = nrm((5, 256, 256))
    p['conv2_b'] = nrm((256,), 0.01)
    p['bn2_gamma'] = 1.0 + nrm((256,), 0.01)
    p['bn2_beta'] = nrm((256,), 0.01)
    p['bn2_mean'] = nrm((256,), 0.01)
    p['bn2_var'] = 1.0 + jnp.abs(nrm((256,), 0.01))

    # LSTM(256, hidden=256, num_layers=2, bidirectional)
    H = 256
    for layer in range(2):
        din = 256 if layer == 0 else 512
        for d in ('fwd', 'bwd'):
            p[f'lstm_l{layer}_{d}_wih'] = nrm((din, 4 * H))
            p[f'lstm_l{layer}_{d}_whh'] = nrm((H, 4 * H))
            p[f'lstm_l{layer}_{d}_b'] = nrm((4 * H,), 0.01)  # b_ih + b_hh combined

    # 3 independent TransformerEncoderLayer(d_model=512, nhead=64, ff=512)
    E = 512
    layers = []
    for _ in range(3):
        layers.append({
            'attn_in_w': nrm((E, 3 * E)), 'attn_in_b': nrm((3 * E,), 0.01),
            'attn_out_w': nrm((E, E)), 'attn_out_b': nrm((E,), 0.01),
            'ffn1_w': nrm((E, 512)), 'ffn1_b': nrm((512,), 0.01),
            'ffn2_w': nrm((512, E)), 'ffn2_b': nrm((E,), 0.01),
            'norm1_g': jnp.ones((E,), jnp.float32),
            'norm1_b': jnp.zeros((E,), jnp.float32),
            'norm2_g': jnp.ones((E,), jnp.float32),
            'norm2_b': jnp.zeros((E,), jnp.float32),
        })
    p['encoder_layers'] = layers

    # head = Linear(512, 5), padded to a lane-dense 128-wide output
    head_w = nrm((E, 5))
    head_b = nrm((5,), 0.01)
    p['head_w_pad'] = jnp.pad(head_w, ((0, 0), (0, 128 - 5)))
    p['head_b_pad'] = jnp.pad(head_b, ((0, 128 - 5),))
    return p


if __name__ == "__main__":
    key = jax.random.PRNGKey(0)
    pkey, xkey, mkey = jax.random.split(key, 3)
    params = init_params(pkey)

    B, Cin, L = 2, 15, 16
    features = jax.random.normal(xkey, (B, Cin, L), dtype=jnp.float32)
    masks = jax.random.uniform(mkey, (B, L)) > 0.3   # boolean token mask
    idx = jnp.arange(B)                              # unused (see TODO)

    out = forward(params, features, masks, idx)
    out = jax.block_until_ready(out)

    assert out.ndim == 2 and out.shape[1] == 5, out.shape
    assert out.shape[0] == int(jnp.sum(masks))
    assert bool(jnp.all(jnp.isfinite(out)))
    print("KERNEL_OK")
</pallas_src>

<mosaic_0001>
module attributes {stable_mosaic.version = 11 : i64} {
  func.func @_conv_bn_relu_kernel(%arg0: i32, %arg1: memref<1x20x15xbf16, #tpu.memory_space<vmem>>, %arg2: memref<5x15x256xbf16, #tpu.memory_space<vmem>>, %arg3: memref<1x256xf32, #tpu.memory_space<vmem>>, %arg4: memref<1x16x256xbf16, #tpu.memory_space<vmem>>) attributes {dimension_semantics = [#tpu.dimension_semantics<parallel>], iteration_bounds = array<i64: 2>, scalar_prefetch = 0 : i64, scratch_operands = 0 : i64, tpu.core_type = #tpu.core_type<tc>, window_params = [{transform_indices = @transform_0, window_bounds = array<i64: 1, 20, 15>}, {pipeline_mode = #tpu.pipeline_mode<synchronous>, transform_indices = @transform_1, window_bounds = array<i64: 5, 15, 256>}, {pipeline_mode = #tpu.pipeline_mode<synchronous>, transform_indices = @transform_2, window_bounds = array<i64: 1, 256>}, {transform_indices = @transform_3, window_bounds = array<i64: 1, 16, 256>}]} {
    %cst = arith.constant 0.000000e+00 : f32
    %0 = vector.broadcast %cst : f32 to vector<16x256xf32>
    %c0 = arith.constant 0 : index
    %c0_0 = arith.constant 0 : index
    %c0_1 = arith.constant 0 : index
    %1 = vector.load %arg1[%c0, %c0_0, %c0_1] : memref<1x20x15xbf16, #tpu.memory_space<vmem>>, vector<1x16x15xbf16>
    %2 = vector.shape_cast %1 : vector<1x16x15xbf16> to vector<16x15xbf16>
    %c0_2 = arith.constant 0 : index
    %c0_3 = arith.constant 0 : index
    %c0_4 = arith.constant 0 : index
    %3 = vector.load %arg2[%c0_2, %c0_3, %c0_4] : memref<5x15x256xbf16, #tpu.memory_space<vmem>>, vector<1x15x256xbf16>
    %4 = vector.shape_cast %3 : vector<1x15x256xbf16> to vector<15x256xbf16>
    %cst_5 = arith.constant dense<0.000000e+00> : vector<16x256xf32>
    %5 = tpu.matmul %2, %4, %cst_5 {dimension_numbers = #tpu.dot_dimension_numbers<[1], [0], [0], [1], [0, 0, 1, 1], [], []>} : vector<16x15xbf16>, vector<15x256xbf16>, vector<16x256xf32> -> vector<16x256xf32>
    %6 = arith.addf %0, %5 : vector<16x256xf32>
    %c0_6 = arith.constant 0 : index
    %c1 = arith.constant 1 : index
    %c0_7 = arith.constant 0 : index
    %7 = vector.load %arg1[%c0_6, %c1, %c0_7] : memref<1x20x15xbf16, #tpu.memory_space<vmem>>, vector<1x16x15xbf16>
    %8 = vector.shape_cast %7 : vector<1x16x15xbf16> to vector<16x15xbf16>
    %c1_8 = arith.constant 1 : index
    %c0_9 = arith.constant 0 : index
    %c0_10 = arith.constant 0 : index
    %9 = vector.load %arg2[%c1_8, %c0_9, %c0_10] : memref<5x15x256xbf16, #tpu.memory_space<vmem>>, vector<1x15x256xbf16>
    %10 = vector.shape_cast %9 : vector<1x15x256xbf16> to vector<15x256xbf16>
    %cst_11 = arith.constant dense<0.000000e+00> : vector<16x256xf32>
    %11 = tpu.matmul %8, %10, %cst_11 {dimension_numbers = #tpu.dot_dimension_numbers<[1], [0], [0], [1], [0, 0, 1, 1], [], []>} : vector<16x15xbf16>, vector<15x256xbf16>, vector<16x256xf32> -> vector<16x256xf32>
    %12 = arith.addf %6, %11 : vector<16x256xf32>
    %c0_12 = arith.constant 0 : index
    %c2 = arith.constant 2 : index
    %c0_13 = arith.constant 0 : index
    %13 = vector.load %arg1[%c0_12, %c2, %c0_13] : memref<1x20x15xbf16, #tpu.memory_space<vmem>>, vector<1x16x15xbf16>
    %14 = vector.shape_cast %13 : vector<1x16x15xbf16> to vector<16x15xbf16>
    %c2_14 = arith.constant 2 : index
    %c0_15 = arith.constant 0 : index
    %c0_16 = arith.constant 0 : index
    %15 = vector.load %arg2[%c2_14, %c0_15, %c0_16] : memref<5x15x256xbf16, #tpu.memory_space<vmem>>, vector<1x15x256xbf16>
    %16 = vector.shape_cast %15 : vector<1x15x256xbf16> to vector<15x256xbf16>
    %cst_17 = arith.constant dense<0.000000e+00> : vector<16x256xf32>
    %17 = tpu.matmul %14, %16, %cst_17 {dimension_numbers = #tpu.dot_dimension_numbers<[1], [0], [0], [1], [0, 0, 1, 1], [], []>} : vector<16x15xbf16>, vector<15x256xbf16>, vector<16x256xf32> -> vector<16x256xf32>
    %18 = arith.addf %12, %17 : vector<16x256xf32>
    %c0_18 = arith.constant 0 : index
    %c3 = arith.constant 3 : index
    %c0_19 = arith.constant 0 : index
    %19 = vector.load %arg1[%c0_18, %c3, %c0_19] : memref<1x20x15xbf16, #tpu.memory_space<vmem>>, vector<1x16x15xbf16>
    %20 = vector.shape_cast %19 : vector<1x16x15xbf16> to vector<16x15xbf16>
    %c3_20 = arith.constant 3 : index
    %c0_21 = arith.constant 0 : index
    %c0_22 = arith.constant 0 : index
    %21 = vector.load %arg2[%c3_20, %c0_21, %c0_22] : memref<5x15x256xbf16, #tpu.memory_space<vmem>>, vector<1x15x256xbf16>
    %22 = vector.shape_cast %21 : vector<1x15x256xbf16> to vector<15x256xbf16>
    %cst_23 = arith.constant dense<0.000000e+00> : vector<16x256xf32>
    %23 = tpu.matmul %20, %22, %cst_23 {dimension_numbers = #tpu.dot_dimension_numbers<[1], [0], [0], [1], [0, 0, 1, 1], [], []>} : vector<16x15xbf16>, vector<15x256xbf16>, vector<16x256xf32> -> vector<16x256xf32>
    %24 = arith.addf %18, %23 : vector<16x256xf32>
    %c0_24 = arith.constant 0 : index
    %c4 = arith.constant 4 : index
    %c0_25 = arith.constant 0 : index
    %25 = vector.load %arg1[%c0_24, %c4, %c0_25] : memref<1x20x15xbf16, #tpu.memory_space<vmem>>, vector<1x16x15xbf16>
    %26 = vector.shape_cast %25 : vector<1x16x15xbf16> to vector<16x15xbf16>
    %c4_26 = arith.constant 4 : index
    %c0_27 = arith.constant 0 : index
    %c0_28 = arith.constant 0 : index
    %27 = vector.load %arg2[%c4_26, %c0_27, %c0_28] : memref<5x15x256xbf16, #tpu.memory_space<vmem>>, vector<1x15x256xbf16>
    %28 = vector.shape_cast %27 : vector<1x15x256xbf16> to vector<15x256xbf16>
    %cst_29 = arith.constant dense<0.000000e+00> : vector<16x256xf32>
    %29 = tpu.matmul %26, %28, %cst_29 {dimension_numbers = #tpu.dot_dimension_numbers<[1], [0], [0], [1], [0, 0, 1, 1], [], []>} : vector<16x15xbf16>, vector<15x256xbf16>, vector<16x256xf32> -> vector<16x256xf32>
    %30 = arith.addf %24, %29 : vector<16x256xf32>
    %c0_30 = arith.constant 0 : index
    %c0_31 = arith.constant 0 : index
    %31 = vector.load %arg3[%c0_30, %c0_31] : memref<1x256xf32, #tpu.memory_space<vmem>>, vector<1x256xf32>
    %32 = vector.broadcast %31 : vector<1x256xf32> to vector<16x256xf32>
    %33 = arith.addf %30, %32 : vector<16x256xf32>
    %cst_32 = arith.constant 0.000000e+00 : f32
    %34 = vector.broadcast %cst_32 : f32 to vector<16x256xf32>
    %35 = arith.maximumf %33, %34 : vector<16x256xf32>
    %36 = arith.truncf %35 : vector<16x256xf32> to vector<16x256xbf16>
    %c0_33 = arith.constant 0 : index
    %c0_34 = arith.constant 0 : index
    %c0_35 = arith.constant 0 : index
    %37 = vector.load %arg4[%c0_33, %c0_34, %c0_35] : memref<1x16x256xbf16, #tpu.memory_space<vmem>>, vector<1x16x256xbf16>
    %38 = vector.shape_cast %37 : vector<1x16x256xbf16> to vector<16x256xbf16>
    %39 = vector.shape_cast %36 : vector<16x256xbf16> to vector<1x16x256xbf16>
    tpu.vector_store %arg4[%c0_33, %c0_34, %c0_35], %39 {strides = array<i32>} : memref<1x16x256xbf16, #tpu.memory_space<vmem>>, vector<1x16x256xbf16>,
    return
  }
  func.func @transform_0(%arg0: i32) -> (i32, i32, i32) {
    %c0_i32 = arith.constant 0 : i32
    %c0_i32_0 = arith.constant 0 : i32
    %c0_i32_1 = arith.constant 0 : i32
    return %arg0, %c0_i32, %c0_i32_0 : i32, i32, i32
  }
  func.func @transform_1(%arg0: i32) -> (i32, i32, i32) {
    %c0_i32 = arith.constant 0 : i32
    %c0_i32_0 = arith.constant 0 : i32
    %c0_i32_1 = arith.constant 0 : i32
    %c0_i32_2 = arith.constant 0 : i32
    return %c0_i32, %c0_i32_0, %c0_i32_1 : i32, i32, i32
  }
  func.func @transform_2(%arg0: i32) -> (i32, i32) {
    %c0_i32 = arith.constant 0 : i32
    %c0_i32_0 = arith.constant 0 : i32
    %c0_i32_1 = arith.constant 0 : i32
    return %c0_i32, %c0_i32_0 : i32, i32
  }
  func.func @transform_3(%arg0: i32) -> (i32, i32, i32) {
    %c0_i32 = arith.constant 0 : i32
    %c0_i32_0 = arith.constant 0 : i32
    %c0_i32_1 = arith.constant 0 : i32
    return %arg0, %c0_i32, %c0_i32_0 : i32, i32, i32
  }
}

</mosaic_0001>

<bundles_post_ra>
// kernel: tpu_custom_call.1
= control target key start
LH: loop header
LB: loop body
LE: loop exit
PB: predicated region body
PF: predicated region fallthrough
CT: control target
= control target key end

     0   :  { %8 = vsyncpa [#allocation3], 0  ;;  %s1132_s0 = inlined_call_operand.vmem [shape: bf16[2,20,15], index: 0, kind: input, shape index: {}]   ;;  %s1133_s1 = inlined_call_operand.hbm [shape: bf16[5,15,256], index: 1, kind: input, shape index: {}]   ;;  %s1134_s2 = inlined_call_operand.vmem [shape: f32[1,256], index: 2, kind: input, shape index: {}]   ;;  %s1135_s3 = inlined_call_operand.hbm [shape: bf16[2,16,256], index: 3, kind: output, shape index: {}]  }
   0x1   :  { %9 = vsyncpa [#allocation4], 0 }
   0x2   :  { %11 = vsyncpa [#allocation4 + $0x1], 0  ;;  %s954_s12 = smov 0   ;;  %s956_s13 = smov 0  }
   0x3   :  { %s958_s14 = smov 0   ;;  %s960_s15 = smov 0  }
   0x4 LB: > { %s975_s16 = sadd.s32 4294967295, %s924_s15   ;;  %s699_s17 = sadd.s32 4294967294, %s924_s15   ;;  %s924_s15 = sphi %s960_s15, %s1151_s15   ;;  %s920_s14 = sphi %s958_s14, %s1150_s14   ;;  %s916_s13 = sphi %s956_s13, %s1149_s13   ;;  %s912_s12 = sphi %s954_s12, %s1148_s12  }
   0x5   : > { %s979_s18 = sadd.s32 1, %s924_s15   ;;  %s92_s19 = sadd.s32 1, %s920_s14 }
   0x6   : > { %s89_s20 = ssub.s32 %s924_s15, %s979_s18  ;;  %p102_p0 = scmp.ne.s32.totalorder %s920_s14, %s916_s13 }
   0x7   : > { %p90_p1 = scmp.eq.s32.totalorder %s89_s20, 0  ;;  %p103_p2 = scmp.eq.s32.totalorder %s975_s16, 1 }
   0x8   : > { %p108_p3 = scmp.ne.s32.totalorder %s916_s13, %s912_s12  ;;  %p109_p4 = scmp.eq.s32.totalorder %s699_s17, 1 }
   0x9   : > { %s990_s21 = scalar_select %p90_p1, %s920_s14, %s92_s19  }
   0xa   : > { %p992_p5 = por %p103_p2, %p102_p0  ;;  %p996_p6 = por %p109_p4, %p108_p3 }
   0xb   : > { %p700_p7 = scmp.ge.s32.totalorder %s924_s15, 1  ;;  %p116_p8 = scmp.lt.s32.totalorder %s924_s15, 3 }
   0xc   : > { %s1139_s22 = scalar_select %p992_p5, 1, 0 }
   0xd   : > { %s1140_s23 = scalar_select %p996_p6, 1, 0 }
   0xe   : > { %p1136_p9 = scmp.eq.s32.totalorder %s975_s16, 0  ;;  %p1003_p10 = pnand %p700_p7, %p116_p8 }
   0xf   : > { %s926_s25 = smov [#allocation2]   ;;  %s830_s30 = scalar_lea.hbm %s1133_s1, 1280 }
  0x10   : > { %s1141_s24 = scalar_select %p1003_p10, 1, 0 }
  0x11   : > { %s128_s26 = sshll.u32 %s926_s25, 4  ;;  %p760_p11 = pneg %p1003_p10  ;;  %s129_s26 = int_to_ptr.vmem [resolvable:$true] %s128_s26 }
  0x12   : > { %p831_p13 = scmp.ne.s32.totalorder %s1133_s1, %s830_s30  ;;  %p837_p3 = scmp.lt.u32.totalorder %s830_s30, %s1133_s1 }
  0x13   : > { %p1011_p12 = pnand %p1136_p9, %p760_p11 }
  0x15   : > { %p832_p0 = pneg %p1011_p12 }
  0x17   : > { %p833_p1 = pnand %p832_p0, %p831_p13 }
  0x19   : > { %p834_p2 = pneg %p833_p1 }
  0x1b   : > { %p839_p4 = pnand %p837_p3, %p834_p2 }
  0x1d   : > { %842 = shalt.err (!%p839_p4)
}
  0x1e   : > { %s843_s8 = scalar_lea.vmem %s129_s26, 1280  ;;  %p851_p9 = scmp.lt.s32.totalorder %s129_s26, %s129_s26 }
  0x1f   : > { %p844_p7 = scmp.ne.s32.totalorder %s129_s26, %s843_s8  ;;  %p852_p6 = scmp.lt.s32.totalorder %s843_s8, %s843_s8 }
  0x21   : > { %p846_p8 = pnand %p844_p7, %p832_p0  ;;  %p853_p5 = por %p852_p6, %p851_p9 }
  0x23   : > { %p847_p11 = pneg %p846_p8 }
  0x25   : > { %p854_p10 = pnand %p853_p5, %p847_p11 }
  0x27   : > { %857 = shalt.err (!%p854_p10)
}
  0x28   : > { %s927_s9 = smov 128   ;;  %s928_s10 = smov 8  }
  0x29   : > { %763 = dma.hbm_to_vmem [thread:$0]  (!%p1011_p12), %s1133_s1, 1280, %s129_s26, [#allocation3], %s927_s9, %s927_s9, %s928_s10  }
  0x2a   : > { %p1143_p13 = scmp.ne.s32.totalorder %s1141_s24, 0 }
  0x2b   : > { %p1144_p1 = scmp.eq.s32.totalorder (!%p1143_p13), %s975_s16, 0 }
  0x2c   : > { %155 = sbr.rel (%p1143_p13) target bundleno = 328 (0x148), region = 32 }
  0x33   : > { %903 = dma.done.wait (%p1144_p1), [#allocation3], 1280   ;;  %p1145_p0 = pmov %p1144_p1 }
  0x34   : > { %vm226_vm0 = vcmask 1046528   ;;  %v929_v0 = vmov 0   ;;  %p179_p5 = scmp.lt.s32.totalorder %s975_s16, 1  ;;  %vm227_vm1 = vcmask 1047552   ;;  %v930_v1 = vmov 65535   ;;  %s176_s29 = sand.u32 1, %s916_s13  }
  0x35   : > { %905 = vsyncadd (%p1145_p0), [#allocation3], 4294966016  ;;  %398 = vmatprep.mubr.bf16.mxu0 %v929_v0  ;;  %268 = vmatprep.mubr.bf16.mxu1 %v929_v0  ;;  %v228_v2 = vsel %vm226_vm0, 4294967295, %v930_v1  ;;  %v810_v4 = vld [vmem:[#allocation2 + $0x24] ss:$8 sps:$4 sm:$0xff]   ;;  %vm222_vm2 = vcmask 121856   ;;  %v579_v57 = vlaneseq }
  0x36   : > { %s180_s19 = scalar_select %p179_p5, %s975_s16, 1  ;;  %v1042_v3 = vsel %vm227_vm1, %v228_v2, 0  ;;  %v812_v5 = vld [vmem:[#allocation2 + $0x14] ss:$8 sps:$4 sm:$0xff]   ;;  %v814_v7 = vld [vmem:[#allocation2 + $0x20] ss:$8 sps:$4 sm:$0xff]  }
  0x37   : > { %v364_v6 = vand.u32 %v810_v4, %v1042_v3  ;;  %v815_v8 = vld [vmem:[#allocation2 + $0x10] ss:$8 sps:$4 sm:$0xff]   ;;  %v234_v10 = vand.u32 %v812_v5, %v1042_v3  ;;  %v361_v12 = vand.u32 %v814_v7, %v1042_v3  ;;  %v820_v18 = vld [vmem:[#allocation2 + $0x34] ss:$8 sps:$4 sm:$0xff]   ;;  %v822_v22 = vld [vmem:[#allocation2] ss:$8 sps:$4 sm:$0xff]  }
  0x38   : > { %s753_s20 = smul.u32 12, %s180_s19  ;;  %v231_v13 = vand.u32 %v815_v8, %v1042_v3  ;;  %v818_v15 = vld [vmem:[#allocation2 + $0x30] ss:$8 sps:$4 sm:$0xff]   ;;  %v453_v24 = vand.u32 %v820_v18, %v1042_v3  ;;  %v824_v26 = vld [vmem:[#allocation2 + $0x4] ss:$8 sps:$4 sm:$0xff]   ;;  %v290_v39 = vand.u32 %v822_v22, %v1042_v3  ;;  %vm509_vm5 = vcmask 1045504  }
  0x39   : > { %366 = vmatprep.subr.bf16.mxu0 %v364_v6  ;;  %236 = vmatprep.subr.bf16.mxu1 %v234_v10  ;;  %v450_v25 = vand.u32 %v818_v15, %v1042_v3  ;;  %v293_v32 = vand.u32 %v824_v26, %v1042_v3  ;;  %v828_v38 = vld [vmem:[#allocation2 + $0x44] ss:$8 sps:$4 sm:$0xff]   ;;  %vm201_vm3 = vsmask.f32 7424  ;;  %v826_v49 = vld [vmem:[#allocation2 + $0x40] ss:$8 sps:$4 sm:$0xff]  }
  0x3a   : > { %s1047_s26 = scalar_lea.vmem %s1132_s0, %s753_s20  ;;  %367 = vmatpush1.bf16.msra.mxu0 %v361_v12  ;;  %237 = vmatpush1.bf16.msra.mxu1 %v231_v13  ;;  %v528_v45 = vand.u32 %v828_v38, %v1042_v3  ;;  %vm420_vm4 = vsmask.f32 6400  ;;  %v525_v51 = vand.u32 %v826_v49, %v1042_v3  ;;  %v580_v58 = vshrl.u32 %v579_v57, 7  ;;  %s705_s30 = sshll.u32 %s176_s29, 4 }
  0x3b   : > { %v1051_v9 = vld [vmem:[%s1047_s26 + $0x4] sm:$0xf]  ;;  %v816_v11 = vld [vmem:[%s1047_s26 + $0x8] ss:$0 sps:$4 sm:$0x11]   ;;  %455 = vmatprep.subr.bf16.mxu0 %v453_v24  ;;  %295 = vmatprep.subr.bf16.mxu1 %v293_v32  ;;  %s178_s4 = scalar_lea.vmem [#allocation5], %s705_s30 }
  0x3c   : > { %v338_v14 = vld [vmem:[%s1047_s26] sm:$0xe]  ;;  %v347_v17 = vrot.slane %v816_v11, 1  ;;  %v210_v21 = vshll.u32 %v816_v11, 16  ;;  %v581_v62 = vsub.s32 0, %v580_v58  ;;  %v585_v1 = vsub.s32 1, %v580_v58 }
  0x3d   : > { %v715_v16 = vcombine.low %v338_v14, %v1051_v9  ;;  %v185_v19 = vld [vmem:[%s1047_s26] sm:$0xf]  ;;  %v825_v29 = vld [vmem:[%s1047_s26 + $0x8] ss:$0 sps:$4 sm:$0x33]   ;;  %s625_s5 = sshll.u32 %s178_s4, 4  ;;  %s1084_s5 = int_to_ptr.vmem [resolvable:$true] %s625_s5 }
  0x3e   : > { %v707_v20 = vcombine.low %v185_v19, %v1051_v9  ;;  %v212_v35 = vrot.slane %v210_v21, 1  ;;  %v430_v36 = vshrl.u32 %v825_v29, 16  ;;  %v433_v37 = vshll.u32 %v825_v29, 16  ;;  %v502_v52 = vld [vmem:[%s1047_s26] sm:$0xc]  ;;  %s736_s6 = sshll.u32 %s975_s16, 8 }
  0x3f   : > { %v346_v23 = vrot.slane %v715_v16, 1  ;;  %v422_v30 = vshrl.u32 %v715_v16, 16  ;;  %v425_v33 = vshll.u32 %v715_v16, 16  ;;  %v723_v53 = vcombine.low %v502_v52, %v1051_v9  ;;  %s1089_s9 = scalar_lea.hbm %s1135_s3, %s736_s6  ;;  %s1091_s10 = scalar_lea.sflag [#allocation4], %s176_s29 }
  0x40   : > { %v203_v27 = vshrl.u32 %v707_v20, 16  ;;  %v205_v28 = vshll.u32 %v707_v20, 16  ;;  %v432_v43 = vrot.slane %v430_v36, 1  ;;  %v435_v44 = vrot.slane %v433_v37, 2  ;;  %s858_s11 = scalar_lea.vmem %s1084_s5, 256  ;;  %p1146_p9 = scmp.ne.s32.totalorder %s1139_s22, 0 }
  0x41   : > { %v348_v31 = vsel %vm226_vm0, %v346_v23, %v347_v17  ;;  %v424_v40 = vrot.slane %v422_v30, 1  ;;  %v427_v41 = vrot.slane %v425_v33, 2  ;;  %v510_v54 = vrot.slane %v723_v53, 2  ;;  %p859_p6 = scmp.ne.s32.totalorder %s1084_s5, %s858_s11  ;;  %s931_s16 = smov [#allocation5]  }
  0x42   : > { %718 = vmatmul.mubr.msk.bf16.vlgmr.msra.gmra.mrb[0].mxu0 %vm222_vm2, %v348_v31  ;;  %v207_v34 = vrot.slane %v205_v28, 1  ;;  %v436_v48 = vor.u32 %v435_v44, %v432_v43  ;;  %v511_v55 = vrot.slane %v825_v29, 2  ;;  %s862_s17 = sshll.u32 %s931_s16, 4  ;;  %s863_s17 = int_to_ptr.vmem [resolvable:$false] %s862_s17 }
  0x43   : > { %456 = vmatpush1.bf16.msra.mxu0 %v450_v25  ;;  %487 = vmatprep.mubr.bf16.mxu0 %v929_v0  ;;  %v428_v47 = vor.u32 %v427_v41, %v424_v40  ;;  %p860_p10 = pnand %p859_p6, %p1146_p9  ;;  %s864_s19 = scalar_lea.vmem %s863_s17, 512 }
  0x44   : > { %v208_v42 = vor.u32 %v207_v34, %v203_v27  ;;  %530 = vmatprep.subr.bf16.mxu0 %v528_v45  ;;  %v512_v56 = vsel %vm509_vm5, %v510_v54, %v511_v55  ;;  %p865_p2 = scmp.lt.s32.totalorder %s1084_s5, %s863_s17  ;;  %p866_p3 = scmp.lt.s32.totalorder %s864_s19, %s858_s11 }
  0x45   : > { %v437_v50 = vsel %vm420_vm4, %v428_v47, %v436_v48  ;;  %p861_p12 = pneg %p860_p10 }
  0x46   : > { %v213_v46 = vsel %vm201_vm3, %v208_v42, %v212_v35  ;;  %p867_p4 = por %p866_p3, %p865_p2 }
  0x47   : > { %711 = vmatmul.mubr.msk.bf16.vlgmr.msra.gmra.mrb[0].mxu1 %vm222_vm2, %v213_v46 }
  0x48   : > { %296 = vmatpush1.bf16.msra.mxu1 %v290_v39  ;;  %327 = vmatprep.mubr.bf16.mxu1 %v929_v0  ;;  %p868_p7 = pnand %p867_p4, %p861_p12 }
  0x4e   : > { %722 = vmatmul.mubr.msk.bf16.vlgmr.msra.gmra.mrb[0].mxu0 %vm222_vm2, %v437_v50 }
  0x4f   : > { %531 = vmatpush1.bf16.msra.mxu0 %v525_v51  ;;  %562 = vmatprep.mubr.bf16.mxu0 %v929_v0  ;;  %v577_v0 = vld [vmem:[%s1134_s2] sm:$0x3] }
  0x50   : > { %v582_v2 = vrot.slane %v577_v0, %v581_v62  ;;  %v586_v4 = vrot.slane %v577_v0, %v585_v1 }
  0x53   : > { %714 = vmatmul.mubr.msk.bf16.vlgmr.msra.gmra.mrb[0].mxu1 %vm222_vm2, %v707_v20 }
  0x5a   : > { %726 = vmatmul.mubr.msk.bf16.vlgmr.msra.gmra.mrb[0].mxu0 %vm222_vm2, %v512_v56 }
 0x126   : > { %v329_v59 = vpop.f32.mrb[0].mxu1 }
 0x127   : > { %v331_v60 = vpop.f32.mrb[1].mxu1 }
 0x128   : > { %v333_v61 = vpop.f32.mrb[2].mxu1 }
 0x129   : > { %v335_v63 = vpop.f32.mrb[3].mxu1 }
 0x12d   : > { %v564_v3 = vpop.f32.mrb[0].mxu0 }
 0x12e   : > { %v737_v5 = vadd.f32 %v564_v3, %v329_v59  ;;  %v566_v6 = vpop.f32.mrb[1].mxu0 }
 0x12f   : > { %v738_v7 = vadd.f32 %v566_v6, %v331_v60  ;;  %v568_v8 = vpop.f32.mrb[2].mxu0 }
 0x130   : > { %v589_v9 = vadd.f32 %v737_v5, %v582_v2  ;;  %v739_v10 = vadd.f32 %v568_v8, %v333_v61  ;;  %v570_v11 = vpop.f32.mrb[3].mxu0 }
 0x131   : > { %v590_v12 = vadd.f32 %v738_v7, %v586_v4  ;;  %v740_v13 = vadd.f32 %v570_v11, %v335_v63 }
 0x132   : > { %v593_v14 = vmax.f32 %v589_v9, 0.0  ;;  %v591_v15 = vadd.f32 %v739_v10, %v582_v2 }
 0x133   : > { %v594_v16 = vmax.f32 %v590_v12, 0.0  ;;  %v592_v17 = vadd.f32 %v740_v13, %v586_v4 }
 0x134   : > { %v595_v18 = vmax.f32 %v591_v15, 0.0 }
 0x135   : > { %v734_v19 = vpack.c.bf16 %v594_v16, %v593_v14  ;;  %v596_v20 = vmax.f32 %v592_v17, 0.0 }
 0x137   : > { %609 = vst [vmem:[%s178_s4] sm:$0xff] %v734_v19  ;;  %v735_v21 = vpack.c.bf16 %v596_v20, %v595_v18 }
 0x139   : > { %610 = vst [vmem:[%s178_s4 + $0x8] sm:$0xff] %v735_v21 }
 0x13a   : > { %871 = shalt.err (!%p868_p7)
}
 0x13b   : > { %s872_s20 = scalar_lea.hbm %s1089_s9, 256  ;;  %s876_s26 = scalar_lea.hbm %s1135_s3, 512 }
 0x13c   : > { %p873_p8 = scmp.ne.s32.totalorder %s1089_s9, %s872_s20  ;;  %p877_p1 = scmp.lt.u32.totalorder %s1089_s9, %s1135_s3 }
 0x13d   : > { %p878_p0 = scmp.lt.u32.totalorder %s876_s26, %s872_s20  ;;  %p880_p6 = scmp.lt.u32.totalorder %s872_s20, %s1089_s9 }
 0x13e   : > { %p874_p11 = pnand %p873_p8, %p1146_p9 }
 0x13f   : > { %p879_p5 = por %p878_p0, %p877_p1 }
 0x140   : > { %p875_p13 = pneg %p874_p11 }
 0x141   : > { %p881_p10 = por %p880_p6, %p879_p5 }
 0x143   : > { %p882_p12 = pnand %p881_p10, %p875_p13 }
 0x145   : > { %885 = shalt.err (!%p882_p12)
}
 0x146   : > { %s932_s29 = smov 128   ;;  %s933_s30 = smov 8  }
 0x147   : > { %758 = dma.vmem_to_hbm [thread:$0]  (%p1146_p9), %s1084_s5, 256, %s1089_s9, %s1091_s10, %s932_s29, %s932_s29, %s933_s30  }
 0x148 PF: > { %p770_p2 = scmp.ge.s32.totalorder %s924_s15, 2  ;;  %s640_s4 = sand.u32 1, %s912_s12  }
 0x149   : > { %p1147_p3 = scmp.ne.s32.totalorder %s1140_s23, 0  ;;  %s641_s6 = scalar_lea.sflag [#allocation4], %s640_s4 }
 0x14b   : > { %p765_p4 = pnand %p770_p2, %p1147_p3 }
 0x14d   : > { %907 = dma.done.wait (!%p765_p4), %s641_s6, 256  }
 0x14e   : > { %909 = vsyncadd (!%p765_p4), %s641_s6, 4294967040  ;;  %p14_p7 = scmp.ge.s32.totalorder %s979_s18, 4   ;;  %s1148_s12 = smov %s916_s13 }
 0x14f   : > { %s1149_s13 = smov %s920_s14  ;;  %s1150_s14 = smov %s990_s21 }
 0x150   : > { %s1151_s15 = smov %s979_s18  ;;  %16 = sbr.rel (!%p14_p7) target bundleno = 4 (0x4), region = 76 }
 0x157   :  { %646 = vsyncpa [#allocation3], 1 }
 0x158   :  { %648 = vsyncpa [#allocation3 + $0x1], 1 }
 0x159   :  { %649 = vsyncpa [#allocation4], 1 }
 0x15a   :  { %651 = vsyncpa [#allocation4 + $0x1], 1 }

</bundles_post_ra>
